<compile_context>
chip_gen: v6e
topology: v6e:2x2x1
jax: 0.10.0
libtpu: 0.0.40
codegen_flags: <defaults>
</compile_context>

<pallas_src>
import jax
import jax.numpy as jnp
from jax.experimental import pallas as pl
from jax.experimental.pallas import tpu as pltpu

EPS = 1e-8


def sublayer_connection_kernel(x_ref, w_ref, b_ref, o_ref):
    # x_ref: (TILE_M, H) pipelined row tile
    # w_ref: (H, H)  bf16 folded weight, VMEM-resident (constant index_map)
    # b_ref: (1, H)  f32 folded bias,   VMEM-resident
    x = x_ref[...]
    xf = x.astype(jnp.float32)                 # no-op for f32 activations
    H = xf.shape[-1]

    # --- LayerNormalization (unbiased std, eps added to sigma) ---
    mean = jnp.mean(xf, axis=-1, keepdims=True)                       # (tm, 1)
    centered = xf - mean
    var_unb = jnp.sum(centered * centered, axis=-1, keepdims=True) * (1.0 / (H - 1))
    sigma = jnp.sqrt(var_unb)                                         # (tm, 1)
    inv_sigma = 1.0 / (sigma + EPS)            # exact; only (tm,1) elements, kernel is HBM-bound
    normed = centered * inv_sigma              # alpha/beta folded into W/b on the host

    # --- sublayer: Linear(H, H) on the MXU (bf16 operands, f32 accumulation) ---
    z = jnp.dot(normed.astype(w_ref.dtype), w_ref[...],
                preferred_element_type=jnp.float32) + b_ref[...]

    # --- dropout (eval: identity) + residual ---
    o_ref[...] = (xf + z).astype(o_ref.dtype)


def sublayer_connection(x, alpha, beta, w, b, *, tile_m=None):
    """x: (B, S, H). Returns x + dropout(Linear(LayerNorm(x))), eval-mode dropout."""
    B, S, H = x.shape
    M = B * S
    x2 = x.reshape(M, H)                       # contiguous reshape: no extra HBM pass

    # Fold the LayerNorm affine and the linear bias into the linear (free host precompute):
    #   (alpha*n + beta) @ W + b  ==  n @ (alpha[:,None]*W) + (beta @ W + b)
    alpha32 = alpha.astype(jnp.float32)
    beta32 = beta.astype(jnp.float32)
    w32 = w.astype(jnp.float32)
    w_folded = (alpha32[:, None] * w32).astype(jnp.bfloat16)          # bf16 MXU operand
    b_folded = (jnp.einsum("h,hk->k", beta32, w32,
                           precision=jax.lax.Precision.HIGHEST)
                + b.astype(jnp.float32)).reshape(1, H)

    # ---- row-tile size: ~2 MiB tiles, >=4 grid steps when possible, multiple of 8 ----
    itemsize = jnp.dtype(x.dtype).itemsize
    if tile_m is None:
        tile_m = (2 << 20) // max(H * itemsize, 1)
    tm = min(int(tile_m), 4096)
    if M > 32:
        tm = min(tm, pl.cdiv(M, 4))            # keep pipeline / v7x megacore busy
    tm = min(tm, M)
    tm = max(8, (tm // 8) * 8)
    grid_m = pl.cdiv(M, tm)                    # ragged last block is masked by Pallas

    # ---- resident weight/bias specs (constant index_map). Single-buffer them once the
    #      weight is big enough for the second buffer to matter (H^2 bytes). ----
    resident_kw = {} if H < 1024 else {"pipeline_mode": pl.Buffered(1)}
    w_spec = pl.BlockSpec((H, H), lambda i: (0, 0), **resident_kw)
    b_spec = pl.BlockSpec((1, H), lambda i: (0, 0), **resident_kw)

    # ---- generation-aware VMEM budget ----
    try:
        vmem_cap = int(getattr(pltpu.get_tpu_info(), "vmem_capacity_bytes", 64 << 20))
    except Exception:
        vmem_cap = 64 << 20                    # conservative (v7x physical VMEM)
    w_bufs = 1 if H >= 1024 else 2
    need = (2 * 2 * tm * H * itemsize          # x + out row tiles, double-buffered
            + w_bufs * (H * H * 2 + H * 4)     # resident bf16 weight + f32 bias
            + 6 * tm * H * 4                   # f32 intermediates / slack
            + (4 << 20))                       # Mosaic scratch headroom
    vmem_limit = int(min(max(need, 16 << 20), vmem_cap * 7 // 8))

    out = pl.pallas_call(
        sublayer_connection_kernel,
        out_shape=jax.ShapeDtypeStruct((M, H), x.dtype),
        grid_spec=pltpu.PrefetchScalarGridSpec(
            num_scalar_prefetch=0,
            grid=(grid_m,),
            in_specs=[
                pl.BlockSpec((tm, H), lambda i: (i, 0)),   # pipelined row tiles
                w_spec,                                     # VMEM-resident weight
                b_spec,                                     # VMEM-resident bias
            ],
            out_specs=pl.BlockSpec((tm, H), lambda i: (i, 0)),
        ),
        compiler_params=pltpu.CompilerParams(
            dimension_semantics=("parallel",),             # independent row tiles
            vmem_limit_bytes=vmem_limit,
        ),
    )(x2, w_folded, b_folded)
    return out.reshape(B, S, H)


def reference(x, alpha, beta, w, b):
    """Module-faithful f32 reference (high-precision matmul)."""
    xf = x.astype(jnp.float32)
    H = xf.shape[-1]
    mean = jnp.mean(xf, axis=-1, keepdims=True)
    centered = xf - mean
    sigma = jnp.sqrt(jnp.sum(centered * centered, axis=-1, keepdims=True) / (H - 1))
    normed = centered / (sigma + EPS)
    y = alpha * normed + beta
    z = jnp.einsum("bsh,hk->bsk", y, w.astype(jnp.float32),
                   precision=jax.lax.Precision.HIGHEST) + b
    return (xf + z).astype(x.dtype)


if __name__ == "__main__":
    # Small, non-tile-aligned shapes: M = B*S = 272 rows -> 5 row tiles of 64
    # (last block ragged, masked by Pallas -- no wrapper-side pad/slice).
    B, S, H = 2, 136, 128
    key = jax.random.PRNGKey(0)
    kx, kw, kb, ka, kbe = jax.random.split(key, 5)

    x = jax.random.normal(kx, (B, S, H), dtype=jnp.float32)

    # LayerNormalization params (perturbed from the ones/zeros init to exercise folding)
    alpha = 1.0 + 0.1 * jax.random.normal(ka, (H,), dtype=jnp.float32)
    beta = 0.1 * jax.random.normal(kbe, (H,), dtype=jnp.float32)

    # Deterministic sublayer = Linear(H, H)
    w = jax.random.normal(kw, (H, H), dtype=jnp.float32) * (H ** -0.5)
    b = 0.01 * jax.random.normal(kb, (H,), dtype=jnp.float32)

    out = jax.block_until_ready(sublayer_connection(x, alpha, beta, w, b))
    ref = reference(x, alpha, beta, w, b)

    assert out.shape == (B, S, H)
    # Tolerance sized for bf16 MXU operands (f32 accumulation) vs the f32 reference.
    max_err = jnp.max(jnp.abs(out - ref))
    assert jnp.allclose(out, ref, atol=2e-2, rtol=2e-2), f"mismatch vs reference: {max_err}"
    print("KERNEL_OK")
</pallas_src>

<mosaic_0001>
module attributes {stable_mosaic.version = 11 : i64} {
  func.func @sublayer_connection_kernel(%arg0: i32, %arg1: memref<64x128xf32, #tpu.memory_space<vmem>>, %arg2: memref<128x128xbf16, #tpu.memory_space<vmem>>, %arg3: memref<1x128xf32, #tpu.memory_space<vmem>>, %arg4: memref<64x128xf32, #tpu.memory_space<vmem>>) attributes {dimension_semantics = [#tpu.dimension_semantics<parallel>], iteration_bounds = array<i64: 5>, scalar_prefetch = 0 : i64, scratch_operands = 0 : i64, tpu.core_type = #tpu.core_type<tc>, window_params = [{transform_indices = @transform_0, window_bounds = array<i64: 64, 128>}, {pipeline_mode = #tpu.pipeline_mode<synchronous>, transform_indices = @transform_1, window_bounds = array<i64: 128, 128>}, {pipeline_mode = #tpu.pipeline_mode<synchronous>, transform_indices = @transform_2, window_bounds = array<i64: 1, 128>}, {transform_indices = @transform_3, window_bounds = array<i64: 64, 128>}]} {
    %c0 = arith.constant 0 : index
    %c0_0 = arith.constant 0 : index
    %0 = vector.load %arg1[%c0, %c0_0] : memref<64x128xf32, #tpu.memory_space<vmem>>, vector<64x128xf32>
    %cst = arith.constant dense<0.000000e+00> : vector<64xf32>
    %1 = vector.multi_reduction <add>, %0, %cst [1] : vector<64x128xf32> to vector<64xf32>
    %2 = vector.shape_cast %1 : vector<64xf32> to vector<64x1xf32>
    %cst_1 = arith.constant 1.280000e+02 : f32
    %3 = vector.broadcast %cst_1 : f32 to vector<64x1xf32>
    %4 = arith.divf %2, %3 : vector<64x1xf32>
    %5 = vector.broadcast %4 : vector<64x1xf32> to vector<64x128xf32>
    %6 = arith.subf %0, %5 : vector<64x128xf32>
    %7 = arith.mulf %6, %6 : vector<64x128xf32>
    %cst_2 = arith.constant dense<0.000000e+00> : vector<64xf32>
    %8 = vector.multi_reduction <add>, %7, %cst_2 [1] : vector<64x128xf32> to vector<64xf32>
    %9 = vector.shape_cast %8 : vector<64xf32> to vector<64x1xf32>
    %cst_3 = arith.constant 0.00787401571 : f32
    %10 = vector.broadcast %cst_3 : f32 to vector<64x1xf32>
    %11 = arith.mulf %9, %10 : vector<64x1xf32>
    %12 = math.sqrt %11 : vector<64x1xf32>
    %cst_4 = arith.constant 9.99999993E-9 : f32
    %13 = vector.broadcast %cst_4 : f32 to vector<64x1xf32>
    %14 = arith.addf %12, %13 : vector<64x1xf32>
    %cst_5 = arith.constant 1.000000e+00 : f32
    %15 = vector.broadcast %cst_5 : f32 to vector<64x1xf32>
    %16 = arith.divf %15, %14 : vector<64x1xf32>
    %17 = vector.broadcast %16 : vector<64x1xf32> to vector<64x128xf32>
    %18 = arith.mulf %6, %17 : vector<64x128xf32>
    %19 = arith.truncf %18 : vector<64x128xf32> to vector<64x128xbf16>
    %c0_6 = arith.constant 0 : index
    %c0_7 = arith.constant 0 : index
    %20 = vector.load %arg2[%c0_6, %c0_7] : memref<128x128xbf16, #tpu.memory_space<vmem>>, vector<128x128xbf16>
    %cst_8 = arith.constant dense<0.000000e+00> : vector<64x128xf32>
    %21 = tpu.matmul %19, %20, %cst_8 {dimension_numbers = #tpu.dot_dimension_numbers<[1], [0], [0], [1], [0, 0, 1, 1], [], []>} : vector<64x128xbf16>, vector<128x128xbf16>, vector<64x128xf32> -> vector<64x128xf32>
    %c0_9 = arith.constant 0 : index
    %c0_10 = arith.constant 0 : index
    %22 = vector.load %arg3[%c0_9, %c0_10] : memref<1x128xf32, #tpu.memory_space<vmem>>, vector<1x128xf32>
    %23 = vector.broadcast %22 : vector<1x128xf32> to vector<64x128xf32>
    %24 = arith.addf %21, %23 : vector<64x128xf32>
    %25 = arith.addf %0, %24 : vector<64x128xf32>
    %c0_11 = arith.constant 0 : index
    %c0_12 = arith.constant 0 : index
    %26 = vector.load %arg4[%c0_11, %c0_12] : memref<64x128xf32, #tpu.memory_space<vmem>>, vector<64x128xf32>
    tpu.vector_store %arg4[%c0_11, %c0_12], %25 {strides = array<i32>} : memref<64x128xf32, #tpu.memory_space<vmem>>, vector<64x128xf32>,
    return
  }
  func.func @transform_0(%arg0: i32) -> (i32, i32) {
    %c0_i32 = arith.constant 0 : i32
    %c0_i32_0 = arith.constant 0 : i32
    return %arg0, %c0_i32 : i32, i32
  }
  func.func @transform_1(%arg0: i32) -> (i32, i32) {
    %c0_i32 = arith.constant 0 : i32
    %c0_i32_0 = arith.constant 0 : i32
    %c0_i32_1 = arith.constant 0 : i32
    return %c0_i32, %c0_i32_0 : i32, i32
  }
  func.func @transform_2(%arg0: i32) -> (i32, i32) {
    %c0_i32 = arith.constant 0 : i32
    %c0_i32_0 = arith.constant 0 : i32
    %c0_i32_1 = arith.constant 0 : i32
    return %c0_i32, %c0_i32_0 : i32, i32
  }
  func.func @transform_3(%arg0: i32) -> (i32, i32) {
    %c0_i32 = arith.constant 0 : i32
    %c0_i32_0 = arith.constant 0 : i32
    return %arg0, %c0_i32 : i32, i32
  }
}

</mosaic_0001>

<bundles_post_ra>
// kernel: tpu_custom_call.1
= control target key start
LH: loop header
LB: loop body
LE: loop exit
PB: predicated region body
PF: predicated region fallthrough
CT: control target
= control target key end

     0   :  { %8 = vsyncpa [#allocation3], 0  ;;  %s1287_s0 = inlined_call_operand.hbm [shape: f32[272,128], index: 0, kind: input, shape index: {}]   ;;  %s1288_s1 = inlined_call_operand.hbm [shape: bf16[128,128], index: 1, kind: input, shape index: {}]   ;;  %s1289_s2 = inlined_call_operand.vmem [shape: f32[1,128], index: 2, kind: input, shape index: {}]   ;;  %s1290_s3 = inlined_call_operand.hbm [shape: f32[272,128], index: 3, kind: output, shape index: {}]  }
   0x1   :  { %10 = vsyncpa [#allocation3 + $0x1], 0 }
   0x2   :  { %11 = vsyncpa [#allocation6], 0 }
   0x3   :  { %12 = vsyncpa [#allocation4], 0 }
   0x4   :  { %14 = vsyncpa [#allocation4 + $0x1], 0  ;;  %s975_s12 = smov 0   ;;  %s977_s13 = smov 0  }
   0x5   :  { %s979_s14 = smov 0   ;;  %s981_s15 = smov 0  }
   0x6 LB: > { %s996_s16 = sadd.s32 4294967295, %s944_s15   ;;  %s641_s17 = sadd.s32 4294967294, %s944_s15   ;;  %s944_s15 = sphi %s981_s15, %s1303_s15   ;;  %s940_s14 = sphi %s979_s14, %s1302_s14   ;;  %s936_s13 = sphi %s977_s13, %s1301_s13   ;;  %s932_s12 = sphi %s975_s12, %s1300_s12  }
   0x7   : > { %s1000_s18 = sadd.s32 1, %s944_s15   ;;  %s27_s19 = sadd.s32 1, %s940_s14 }
   0x8   : > { %s24_s20 = ssub.s32 %s944_s15, %s1000_s18  ;;  %p34_p0 = scmp.ne.s32.totalorder %s940_s14, %s936_s13 }
   0x9   : > { %p25_p1 = scmp.eq.s32.totalorder %s24_s20, 0  ;;  %p35_p2 = scmp.eq.s32.totalorder %s944_s15, 0 }
   0xa   : > { %p40_p3 = scmp.ne.s32.totalorder %s936_s13, %s932_s12  ;;  %p41_p4 = scmp.eq.s32.totalorder %s996_s16, 0 }
   0xb   : > { %s1012_s21 = scalar_select %p25_p1, %s940_s14, %s27_s19  }
   0xc   : > { %p1014_p5 = por %p35_p2, %p34_p0  ;;  %p1020_p6 = por %p41_p4, %p40_p3 }
   0xd   : > { %p106_p7 = scmp.eq.s32.totalorder %s996_s16, 4  ;;  %p112_p8 = scmp.eq.s32.totalorder %s641_s17, 4 }
   0xe   : > { %s1293_s23 = scalar_select %p1020_p6, 1, 0 }
   0xf   : > { %p642_p9 = scmp.ge.s32.totalorder %s944_s15, 1  ;;  %p119_p10 = scmp.lt.s32.totalorder %s944_s15, 6 }
  0x10   : > { %p1027_p11 = por %p106_p7, %p34_p0  ;;  %p1031_p12 = por %p112_p8, %p40_p3 }
  0x11   : > { %p1035_p13 = pnand %p642_p9, %p119_p10  ;;  %s946_s27 = smov [#allocation5]  }
  0x12   : > { %s1294_s24 = scalar_select %p1027_p11, 1, 0 }
  0x13   : > { %s1295_s25 = scalar_select %p1031_p12, 1, 0 }
  0x14   : > { %p734_p1 = pneg %p1035_p13  ;;  %s131_s28 = sshll.u32 %s946_s27, 4  ;;  %s132_s28 = int_to_ptr.vmem [resolvable:$true] %s131_s28 }
  0x15   : > { %s835_s29 = scalar_lea.vmem %s132_s28, 1024  ;;  %p843_p8 = scmp.lt.s32.totalorder %s132_s28, %s132_s28 }
  0x16   : > { %p735_p2 = pnand %p734_p1, %p41_p4  ;;  %p836_p7 = scmp.ne.s32.totalorder %s132_s28, %s835_s29 }
  0x17   : > { %p844_p6 = scmp.lt.s32.totalorder %s835_s29, %s835_s29 }
  0x18   : > { %p826_p0 = pneg %p735_p2 }
  0x19   : > { %p845_p12 = por %p844_p6, %p843_p8 }
  0x1a   : > { %p838_p11 = pnand %p836_p7, %p826_p0 }
  0x1c   : > { %p839_p3 = pneg %p838_p11 }
  0x1e   : > { %p846_p9 = pnand %p845_p12, %p839_p3 }
  0x20   : > { %849 = shalt.err (!%p846_p9)
}
  0x21   : > { %s947_s30 = smov 64   ;;  %s948_s4 = smov 4  }
  0x22   : > { %737 = dma.hbm_to_vmem [thread:$0]  (!%p735_p2), %s1288_s1, 1024, %s132_s28, [#allocation6], %s947_s30, %s947_s30, %s948_s4  }
  0x23   : > { %p644_p10 = scmp.ge.s32.totalorder %s944_s15, 5 }
  0x25   : > { %144 = sbr.rel (%p644_p10) target bundleno = 74 (0x4a), region = 24 }
  0x2a   : > { %147 = sbr.rel (!%p1014_p5) target bundleno = 74 (0x4a), region = 28  ;;  %s148_s7 = sand.u32 (%p1014_p5), 1, %s940_s14  }
  0x2b   : > { %s646_s8 = sshll.u32 (%p1014_p5), %s944_s15, 3  ;;  %s645_s9 = sshll.u32 (%p1014_p5), %s148_s7, 6 }
  0x2c   : > { %s154_s10 = ssub.s32 (%p1014_p5), 34, %s646_s8  ;;  %s1054_s19 = scalar_lea.sflag (%p1014_p5), [#allocation3], %s148_s7 }
  0x2d   : > { %p155_p6 = scmp.lt.s32.totalorder (%p1014_p5), %s154_s10, 8  ;;  %s152_s20 = scalar_lea.vmem (%p1014_p5), [#allocation2], %s645_s9 }
  0x2f   : > { %s1305_s10 = smov (!%p155_p6, %s154_s10), 8 }
  0x30   : > { %s1051_s11 = sshll.u32 %s1305_s10, 7 }
  0x31   : > { %s159_s17 = ssub.s32 1024, %s1051_s11 }
  0x32   : > { %160 = vsyncadd %s1054_s19, %s159_s17  ;;  %p648_p5 = scmp.ne.s32.totalorder %s1051_s11, 0  ;;  %s674_s22 = sshll.u32 %s944_s15, 10 }
  0x33   : > { %s1062_s29 = scalar_lea.hbm %s1287_s0, %s674_s22  ;;  %s165_s30 = sshll.u32 %s152_s20, 4  ;;  %s1064_s30 = int_to_ptr.vmem [resolvable:$true] %s165_s30 }
  0x34   : > { %s850_s4 = scalar_lea.hbm %s1062_s29, %s1051_s11  ;;  %s854_s7 = scalar_lea.hbm %s1287_s0, 4352 }
  0x35   : > { %p851_p11 = scmp.ne.s32.totalorder %s1062_s29, %s850_s4  ;;  %p855_p2 = scmp.lt.s32.totalorder %s1062_s29, %s1287_s0 }
  0x36   : > { %p856_p0 = scmp.lt.s32.totalorder %s854_s7, %s850_s4 }
  0x37   : > { %p852_p12 = pnand %p851_p11, %p648_p5 }
  0x38   : > { %p857_p7 = por %p856_p0, %p855_p2 }
  0x39   : > { %p853_p1 = pneg %p852_p12 }
  0x3b   : > { %p858_p3 = pnand %p857_p7, %p853_p1 }
  0x3d   : > { %861 = shalt.err (!%p858_p3)
}
  0x3e   : > { %s862_s10 = scalar_lea.vmem %s1064_s30, %s1051_s11  ;;  %s949_s17 = smov [#allocation2]  }
  0x3f   : > { %p863_p8 = scmp.ne.s32.totalorder %s1064_s30, %s862_s10  ;;  %s866_s20 = sshll.u32 %s949_s17, 4  ;;  %s867_s20 = int_to_ptr.vmem [resolvable:$false] %s866_s20 }
  0x40   : > { %s868_s22 = scalar_lea.vmem %s867_s20, 2048  ;;  %p869_p6 = scmp.lt.s32.totalorder %s1064_s30, %s867_s20 }
  0x41   : > { %p864_p9 = pnand %p863_p8, %p648_p5  ;;  %p870_p11 = scmp.lt.s32.totalorder %s868_s22, %s862_s10 }
  0x43   : > { %p865_p10 = pneg %p864_p9  ;;  %p871_p12 = por %p870_p11, %p869_p6 }
  0x45   : > { %p872_p2 = pnand %p871_p12, %p865_p10 }
  0x47   : > { %875 = shalt.err (!%p872_p2)
}
  0x48   : > { %s950_s27 = smov 128   ;;  %s951_s28 = smov 8  }
  0x49   : > { %171 = dma.hbm_to_vmem [thread:$0]  (%p648_p5), %s1062_s29, %s1051_s11, %s1064_s30, %s1054_s19, %s950_s27, %s950_s27, %s951_s28  }
  0x4a PF: > { %177 = sbr.rel (%p1035_p13) target bundleno = 652 (0x28c), region = 32  ;;  %s1093_s4 = sand.u32 (!%p1035_p13), 1, %s936_s13  }
  0x4b   : > { %s653_s5 = sshll.u32 (!%p1035_p13), %s1093_s4, 6  ;;  %s180_s6 = scalar_lea.sflag (!%p1035_p13), [#allocation3], %s1093_s4 }
  0x4c   : > { %s183_s7 = scalar_lea.vmem (!%p1035_p13), [#allocation2], %s653_s5  ;;  %p1297_p1 = scmp.ne.s32.totalorder (!%p1035_p13), %s1293_s23, 0 }
  0x4f   : > { %919 = dma.done.wait (%p1297_p1), %s180_s6, 1024  }
  0x50   : > { %921 = vsyncadd (%p1297_p1), %s180_s6, 4294966272 }
  0x51   : > { %923 = dma.done.wait (%p41_p4), [#allocation6], 1024  }
  0x52   : > { %925 = vsyncadd (%p41_p4), [#allocation6], 4294966272  ;;  %v1107_v0 = vld [vmem:[%s183_s7] sm:$0xff]  ;;  %v1113_v2 = vld [vmem:[%s183_s7 + $0x8] sm:$0xff]  ;;  %s1209_s11 = scalar_lea.vmem [#allocation7], %s653_s5  ;;  %s539_s19 = scalar_lea.sflag [#allocation4], %s1093_s4 }
  0x53   : > { %v1109_v1 = vld [vmem:[%s183_s7 + $0x20] sm:$0xff]  ;;  %229 = vadd.xlane.f32.xlu0 %v1107_v0  ;;  %v1115_v3 = vld [vmem:[%s183_s7 + $0x28] sm:$0xff]  ;;  %v1117_v4 = vld [vmem:[%s183_s7 + $0x10] sm:$0xff]  ;;  %p1298_p4 = scmp.ne.s32.totalorder %s1294_s24, 0 }
  0x54   : > { %237 = vadd.xlane.f32.xlu1 %v1109_v1  ;;  %v1119_v5 = vld [vmem:[%s183_s7 + $0x18] sm:$0xff]  ;;  %v1125_v6 = vld [vmem:[%s183_s7 + $0x30] sm:$0xff]  ;;  %v786_v42 = vld [vmem:[#allocation5 + $0x28] sm:$0xff]   ;;  %s666_s29 = sshll.u32 (%p1298_p4), %s996_s16, 3 }
  0x55   : > { %v1127_v7 = vld [vmem:[%s183_s7 + $0x38] sm:$0xff]  ;;  %v785_v41 = vld [vmem:[#allocation5 + $0x30] sm:$0xff]   ;;  %v787_v43 = vld [vmem:[#allocation5 + $0x20] sm:$0xff]   ;;  %s547_s30 = ssub.s32 (%p1298_p4), 34, %s666_s29 }
  0x56   : > { %v784_v40 = vld [vmem:[#allocation5 + $0x38] sm:$0xff]   ;;  %v789_v45 = vld [vmem:[#allocation5 + $0x10] sm:$0xff]   ;;  %v790_v46 = vld [vmem:[#allocation5 + $0x8] sm:$0xff]   ;;  %p548_p13 = scmp.lt.s32.totalorder (%p1298_p4), %s547_s30, 8 }
  0x57   : > { %231 = vadd.xlane.f32.xlu0 %v1113_v2  ;;  %688 = vmatprep.subr.bf16.mxu0 %v784_v40  ;;  %v788_v44 = vld [vmem:[#allocation5 + $0x18] sm:$0xff]   ;;  %v791_v47 = vld [vmem:[#allocation5] sm:$0xff]  }
  0x58   : > { %239 = vadd.xlane.f32.xlu1 %v1115_v3  ;;  %712 = vmatprep.subr.bf16.mxu1 %v784_v40 }
  0x59   : > { %689 = vmatpush3.bf16.msra.mxu0 %v784_v40  ;;  %720 = vmatpush3.bf16.msra.mxu1 %v784_v40 }
  0x5a   : > { %690 = vmatprep.subr.bf16.mxu0 %v785_v41  ;;  %713 = vmatprep.subr.bf16.mxu1 %v785_v41 }
  0x5b   : > { %233 = vadd.xlane.f32.xlu0 %v1117_v4 }
  0x5c   : > { %235 = vadd.xlane.f32.xlu1 %v1119_v5 }
  0x5d   : > { %691 = vmatpush3.bf16.msra.mxu0 %v785_v41  ;;  %721 = vmatpush3.bf16.msra.mxu1 %v785_v41 }
  0x5e   : > { %692 = vmatprep.subr.bf16.mxu0 %v786_v42  ;;  %714 = vmatprep.subr.bf16.mxu1 %v786_v42 }
  0x5f   : > { %241 = vadd.xlane.f32.xlu0 %v1125_v6 }
  0x60   : > { %243 = vadd.xlane.f32.xlu1 %v1127_v7 }
  0x61   : > { %693 = vmatpush3.bf16.msra.mxu0 %v786_v42  ;;  %722 = vmatpush3.bf16.msra.mxu1 %v786_v42 }
  0x62   : > { %694 = vmatprep.subr.bf16.mxu0 %v787_v43  ;;  %715 = vmatprep.subr.bf16.mxu1 %v787_v43 }
  0x65   : > { %695 = vmatpush3.bf16.msra.mxu0 %v787_v43  ;;  %723 = vmatpush3.bf16.msra.mxu1 %v787_v43 }
  0x66   : > { %696 = vmatprep.subr.bf16.mxu0 %v788_v44  ;;  %716 = vmatprep.subr.bf16.mxu1 %v788_v44 }
  0x69   : > { %697 = vmatpush3.bf16.msra.mxu0 %v788_v44  ;;  %724 = vmatpush3.bf16.msra.mxu1 %v788_v44 }
  0x6a   : > { %698 = vmatprep.subr.bf16.mxu0 %v789_v45  ;;  %717 = vmatprep.subr.bf16.mxu1 %v789_v45 }
  0x6d   : > { %699 = vmatpush3.bf16.msra.mxu0 %v789_v45  ;;  %725 = vmatpush3.bf16.msra.mxu1 %v789_v45 }
  0x6e   : > { %700 = vmatprep.subr.bf16.mxu0 %v790_v46  ;;  %718 = vmatprep.subr.bf16.mxu1 %v790_v46 }
  0x71   : > { %701 = vmatpush3.bf16.msra.mxu0 %v790_v46  ;;  %726 = vmatpush3.bf16.msra.mxu1 %v790_v46 }
  0x72   : > { %702 = vmatprep.subr.bf16.mxu0 %v791_v47  ;;  %719 = vmatprep.subr.bf16.mxu1 %v791_v47 }
  0x75   : > { %703 = vmatpush3.bf16.msra.mxu0 %v791_v47  ;;  %727 = vmatpush3.bf16.msra.mxu1 %v791_v47 }
  0xdc   : > { %v230_v8 = vpop.xlane.xlu0 %229 }
  0xdd   : > { %v238_v9 = vpop.xlane.xlu1 %237  ;;  %v246_v10 = vmul.f32 0.0078125, %v230_v8 }
  0xde   : > { %v250_v11 = vmul.f32 0.0078125, %v238_v9 }
  0xdf   : > { %v1132_v12 = vsub.f32 %v1107_v0, %v246_v10 }
  0xe0   : > { %v1135_v13 = vsub.f32 %v1109_v1, %v250_v11  ;;  %v232_v14 = vpop.xlane.xlu0 %231 }
  0xe1   : > { %v240_v15 = vpop.xlane.xlu1 %239  ;;  %v247_v16 = vmul.f32 0.0078125, %v232_v14  ;;  %v262_v17 = vmul.f32 %v1132_v12, %v1132_v12 }
  0xe2   : > { %v251_v18 = vmul.f32 0.0078125, %v240_v15  ;;  %v266_v21 = vmul.f32 %v1135_v13, %v1135_v13 }
  0xe3   : > { %v1140_v19 = vsub.f32 %v1113_v2, %v247_v16  ;;  %270 = vadd.xlane.f32.xlu0 %v262_v17 }
  0xe4   : > { %v1143_v20 = vsub.f32 %v1115_v3, %v251_v18  ;;  %v234_v22 = vpop.xlane.xlu0 %233 }
  0xe5   : > { %v236_v23 = vpop.xlane.xlu1 %235  ;;  %v248_v24 = vmul.f32 0.0078125, %v234_v22  ;;  %v263_v25 = vmul.f32 %v1140_v19, %v1140_v19 }
  0xe6   : > { %v249_v26 = vmul.f32 0.0078125, %v236_v23  ;;  %v267_v29 = vmul.f32 %v1143_v20, %v1143_v20 }
  0xe7   : > { %v1150_v27 = vsub.f32 %v1117_v4, %v248_v24  ;;  %278 = vadd.xlane.f32.xlu0 %v266_v21  ;;  %272 = vadd.xlane.f32.xlu1 %v263_v25 }
  0xe8   : > { %v1153_v28 = vsub.f32 %v1119_v5, %v249_v26  ;;  %v242_v30 = vpop.xlane.xlu0 %241 }
  0xe9   : > { %v244_v31 = vpop.xlane.xlu1 %243  ;;  %v252_v32 = vmul.f32 0.0078125, %v242_v30  ;;  %v264_v33 = vmul.f32 %v1150_v27, %v1150_v27 }
  0xea   : > { %v253_v34 = vmul.f32 0.0078125, %v244_v31  ;;  %v265_v37 = vmul.f32 %v1153_v28, %v1153_v28 }
  0xeb   : > { %v1160_v35 = vsub.f32 %v1125_v6, %v252_v32  ;;  %280 = vadd.xlane.f32.xlu1 %v267_v29  ;;  %274 = vadd.xlane.f32.xlu0 %v264_v33 }
  0xec   : > { %v1163_v36 = vsub.f32 %v1127_v7, %v253_v34 }
  0xed   : > { %v268_v38 = vmul.f32 %v1160_v35, %v1160_v35 }
  0xee   : > { %v269_v39 = vmul.f32 %v1163_v36, %v1163_v36 }
  0xef   : > { %276 = vadd.xlane.f32.xlu1 %v265_v37  ;;  %282 = vadd.xlane.f32.xlu0 %v268_v38 }
  0xf3   : > { %284 = vadd.xlane.f32.xlu1 %v269_v39 }
 0x16c   : > { %v271_v48 = vpop.xlane.xlu0 %270 }
 0x16d   : > { %v286_v49 = vmul.f32 0.007874016, %v271_v48 }
 0x16f   : > { %792 = vrsqrt.f32 %v286_v49  ;;  %vm296_vm0 = vcmp.eq.f32.partialorder %v286_v49, inf  ;;  %v299_v10 = vand.u32 2147483648, %v286_v49  ;;  %vm298_vm1 = vcmp.eq.f32.partialorder %v286_v49, 0.0 }
 0x170   : > { %v273_v50 = vpop.xlane.xlu1 %272  ;;  %v279_v51 = vpop.xlane.xlu0 %278 }
 0x171   : > { %v287_v52 = vmul.f32 0.007874016, %v273_v50  ;;  %v290_v53 = vmul.f32 0.007874016, %v279_v51 }
 0x173   : > { %794 = vrsqrt.f32 %v287_v52  ;;  %vm303_vm2 = vcmp.eq.f32.partialorder %v287_v52, inf  ;;  %v306_v21 = vand.u32 2147483648, %v287_v52  ;;  %vm305_vm3 = vcmp.eq.f32.partialorder %v287_v52, 0.0 }
 0x174   : > { %796 = vrsqrt.f32 %v290_v53  ;;  %v281_v54 = vpop.xlane.xlu1 %280  ;;  %v275_v55 = vpop.xlane.xlu0 %274  ;;  %vm324_vm4 = vcmp.eq.f32.partialorder %v290_v53, inf  ;;  %v327_v24 = vand.u32 2147483648, %v290_v53  ;;  %vm326_vm5 = vcmp.eq.f32.partialorder %v290_v53, 0.0 }
 0x175   : > { %v291_v56 = vmul.f32 0.007874016, %v281_v54  ;;  %v288_v57 = vmul.f32 0.007874016, %v275_v55 }
 0x177   : > { %798 = vrsqrt.f32 %v291_v56  ;;  %vm331_vm6 = vcmp.eq.f32.partialorder %v291_v56, inf  ;;  %vm333_vm7 = vcmp.eq.f32.partialorder %v291_v56, 0.0  ;;  %v334_v34 = vand.u32 2147483648, %v291_v56 }
 0x178   : > { %800 = vrsqrt.f32 %v288_v57  ;;  %v277_v58 = vpop.xlane.xlu1 %276  ;;  %v283_v59 = vpop.xlane.xlu0 %282  ;;  %vm310_vm8 = vcmp.eq.f32.partialorder %v288_v57, inf  ;;  %v313_v40 = vand.u32 2147483648, %v288_v57  ;;  %vm312_vm9 = vcmp.eq.f32.partialorder %v288_v57, 0.0 }
 0x179   : > { %v1171_v60 = vmul.f32 0.007874016, %v277_v58  ;;  %v1173_v61 = vmul.f32 0.007874016, %v283_v59 }
 0x17b   : > { %802 = vrsqrt.f32 %v1171_v60  ;;  %vm317_vm10 = vcmp.eq.f32.partialorder %v1171_v60, inf  ;;  %vm319_vm11 = vcmp.eq.f32.partialorder %v1171_v60, 0.0  ;;  %v320_v48 = vand.u32 2147483648, %v1171_v60 }
 0x17c   : > { %v793_v62 = vpop.eup %792  ;;  %804 = vrsqrt.f32 %v1173_v61  ;;  %v285_v63 = vpop.xlane.xlu1 %284  ;;  %vm338_vm12 = vcmp.eq.f32.partialorder %v1173_v61, inf  ;;  %vm340_vm13 = vcmp.eq.f32.partialorder %v1173_v61, 0.0 }
 0x17d   : > { %v295_v8 = vmul.f32 %v793_v62, %v286_v49  ;;  %v1177_v9 = vmul.f32 0.007874016, %v285_v63 }
 0x17f   : > { %v297_v11 = vsel %vm296_vm0, %v286_v49, %v295_v8  ;;  %806 = vrsqrt.f32 %v1177_v9  ;;  %vm345_vm14 = vcmp.eq.f32.partialorder %v1177_v9, inf  ;;  %vm347_vm15 = vcmp.eq.f32.partialorder %v1177_v9, 0.0 }
 0x180   : > { %v795_v14 = vpop.eup %794  ;;  %v300_v15 = vsel %vm298_vm1, %v299_v10, %v297_v11 }
 0x181   : > { %v797_v16 = vpop.eup %796  ;;  %v302_v17 = vmul.f32 %v795_v14, %v287_v52  ;;  %v350_v18 = vadd.f32 1e-08, %v300_v15 }
 0x182   : > { %v323_v22 = vmul.f32 %v797_v16, %v290_v53 }
 0x183   : > { %v304_v23 = vsel %vm303_vm2, %v287_v52, %v302_v17  ;;  %808 = vrcp.f32 %v350_v18  ;;  %v341_v52 = vand.u32 2147483648, %v1173_v61 }
 0x184   : > { %v799_v25 = vpop.eup %798  ;;  %v325_v26 = vsel %vm324_vm4, %v290_v53, %v323_v22  ;;  %v307_v29 = vsel %vm305_vm3, %v306_v21, %v304_v23 }
 0x185   : > { %v801_v30 = vpop.eup %800  ;;  %v330_v31 = vmul.f32 %v799_v25, %v291_v56  ;;  %v351_v32 = vadd.f32 1e-08, %v307_v29  ;;  %v328_v33 = vsel %vm326_vm5, %v327_v24, %v325_v26 }
 0x186   : > { %v309_v37 = vmul.f32 %v801_v30, %v288_v57  ;;  %v354_v38 = vadd.f32 1e-08, %v328_v33 }
 0x187   : > { %v332_v39 = vsel %vm331_vm6, %v291_v56, %v330_v31  ;;  %810 = vrcp.f32 %v351_v32 }
 0x188   : > { %v803_v41 = vpop.eup %802  ;;  %v311_v42 = vsel %vm310_vm8, %v288_v57, %v309_v37  ;;  %v335_v43 = vsel %vm333_vm7, %v334_v34, %v332_v39  ;;  %812 = vrcp.f32 %v354_v38 }
 0x189   : > { %v805_v44 = vpop.eup %804  ;;  %v316_v45 = vmul.f32 %v803_v41, %v1171_v60  ;;  %v355_v46 = vadd.f32 1e-08, %v335_v43  ;;  %v314_v47 = vsel %vm312_vm9, %v313_v40, %v311_v42 }
 0x18a   : > { %v337_v49 = vmul.f32 %v805_v44, %v1173_v61  ;;  %v352_v50 = vadd.f32 1e-08, %v314_v47 }
 0x18b   : > { %v318_v51 = vsel %vm317_vm10, %v1171_v60, %v316_v45  ;;  %814 = vrcp.f32 %v355_v46  ;;  %v348_v60 = vand.u32 2147483648, %v1177_v9 }
 0x18c   : > { %v807_v53 = vpop.eup %806  ;;  %v339_v54 = vsel %vm338_vm12, %v1173_v61, %v337_v49  ;;  %v321_v55 = vsel %vm319_vm11, %v320_v48, %v318_v51  ;;  %816 = vrcp.f32 %v352_v50 }
 0x18d   : > { %v342_v56 = vsel %vm340_vm13, %v341_v52, %v339_v54  ;;  %v344_v57 = vmul.f32 %v807_v53, %v1177_v9  ;;  %v353_v58 = vadd.f32 1e-08, %v321_v55 }
 0x18e   : > { %v356_v59 = vadd.f32 1e-08, %v342_v56 }
 0x18f   : > { %v346_v62 = vsel %vm345_vm14, %v1177_v9, %v344_v57  ;;  %818 = vrcp.f32 %v353_v58 }
 0x190   : > { %v349_v63 = vsel %vm347_vm15, %v348_v60, %v346_v62  ;;  %820 = vrcp.f32 %v356_v59  ;;  %v809_v61 = vpop.eup %808 }
 0x191   : > { %v357_v8 = vadd.f32 1e-08, %v349_v63  ;;  %v374_v11 = vmul.f32 %v809_v61, %v1132_v12 }
 0x193   : > { %822 = vrcp.f32 %v357_v8 }
 0x194   : > { %v811_v10 = vpop.eup %810 }
 0x195   : > { %v375_v14 = vmul.f32 %v811_v10, %v1140_v19  ;;  %v813_v15 = vpop.eup %812 }
 0x196   : > { %v378_v18 = vmul.f32 %v813_v15, %v1135_v13 }
 0x197   : > { %v382_v16 = vpack.c.bf16 %v375_v14, %v374_v11 }
 0x198   : > { %v815_v17 = vpop.eup %814 }
 0x199   : > { %704 = vmatprep.mubr.bf16.mxu0 %v382_v16  ;;  %v379_v21 = vmul.f32 %v815_v17, %v1143_v20  ;;  %v817_v9 = vpop.eup %816  ;;  %v656_v20 = vld [vmem:[%s1289_s2] ss:$0 sm:$0xff] }
 0x19a   : > { %v376_v24 = vmul.f32 %v817_v9, %v1150_v27 }
 0x19b   : > { %v384_v22 = vpack.c.bf16 %v379_v21, %v378_v18 }
 0x19c   : > { %v819_v23 = vpop.eup %818 }
 0x19d   : > { %708 = vmatprep.mubr.bf16.mxu1 %v384_v22  ;;  %v377_v25 = vmul.f32 %v819_v23, %v1153_v28  ;;  %v821_v26 = vpop.eup %820 }
 0x19e   : > { %v380_v29 = vmul.f32 %v821_v26, %v1160_v35 }
 0x19f   : > { %v383_v12 = vpack.c.bf16 %v377_v25, %v376_v24 }
 0x1a0   : > { %v823_v19 = vpop.eup %822 }
 0x1a1   : > { %705 = vmatmul.mubr.bf16.vlgmr.msra.gmra.mxu0 %v383_v12  ;;  %v381_v30 = vmul.f32 %v823_v19, %v1163_v36 }
 0x1a3   : > { %v385_v13 = vpack.c.bf16 %v381_v30, %v380_v29 }
 0x1a5   : > { %709 = vmatmul.mubr.bf16.vlgmr.msra.gmra.mxu1 %v385_v13 }
 0x261   : > { %v706_v31 = vpop.f32.mrf.mxu0 }
 0x262   : > { %v500_v32 = vadd.f32 %v706_v31, %v656_v20 }
 0x263   : > { %v491_v27 = vpop.f32.mrf.mxu0 }
 0x264   : > { %v524_v28 = vadd.f32 %v500_v32, %v1117_v4  ;;  %v492_v33 = vadd.f32 %v656_v20, %v491_v27 }
 0x265   : > { %v707_v34 = vpop.f32.mrf.mxu0  ;;  %v710_v37 = vpop.f32.mrf.mxu1 }
 0x266   : > { %532 = vst [vmem:[%s1209_s11 + $0x10] sm:$0xff] %v524_v28  ;;  %v522_v35 = vadd.f32 %v492_v33, %v1107_v0  ;;  %v503_v36 = vadd.f32 %v707_v34, %v656_v20  ;;  %v516_v38 = vadd.f32 %v710_v37, %v656_v20 }
 0x267   : > { %v494_v39 = vpop.f32.mrf.mxu0  ;;  %v507_v40 = vpop.f32.mrf.mxu1 }
 0x268   : > { %530 = vst [vmem:[%s1209_s11] sm:$0xff] %v522_v35  ;;  %v525_v4 = vadd.f32 %v503_v36, %v1119_v5  ;;  %v528_v41 = vadd.f32 %v516_v38, %v1125_v6  ;;  %v495_v42 = vadd.f32 %v656_v20, %v494_v39  ;;  %v508_v43 = vadd.f32 %v656_v20, %v507_v40 }
 0x269   : > { %v711_v44 = vpop.f32.mrf.mxu1 }
 0x26a   : > { %533 = vst [vmem:[%s1209_s11 + $0x18] sm:$0xff] %v525_v4  ;;  %536 = vst [vmem:[%s1209_s11 + $0x30] sm:$0xff] %v528_v41  ;;  %v523_v0 = vadd.f32 %v495_v42, %v1113_v2  ;;  %v526_v45 = vadd.f32 %v508_v43, %v1109_v1  ;;  %v519_v46 = vadd.f32 %v711_v44, %v656_v20 }
 0x26b   : > { %v510_v47 = vpop.f32.mrf.mxu1 }
 0x26c   : > { %531 = vst [vmem:[%s1209_s11 + $0x8] sm:$0xff] %v523_v0  ;;  %534 = vst [vmem:[%s1209_s11 + $0x20] sm:$0xff] %v526_v45  ;;  %v529_v48 = vadd.f32 %v519_v46, %v1127_v7  ;;  %v511_v5 = vadd.f32 %v656_v20, %v510_v47  ;;  %545 = sbr.rel (!%p1298_p4) target bundleno = 652 (0x28c), region = 44 }
 0x26e   : > { %537 = vst [vmem:[%s1209_s11 + $0x38] sm:$0xff] %v529_v48  ;;  %v527_v6 = vadd.f32 %v511_v5, %v1115_v3 }
 0x270   : > { %535 = vst [vmem:[%s1209_s11 + $0x28] sm:$0xff] %v527_v6 }
 0x271   : > { %s1307_s30 = smov (!%p548_p13, %s547_s30), 8 }
 0x272   : > { %s1230_s8 = sshll.u32 %s1307_s30, 7 }
 0x273   : > { %s552_s9 = ssub.s32 1024, %s1230_s8 }
 0x274   : > { %553 = vsyncadd %s539_s19, %s552_s9  ;;  %p668_p5 = scmp.ne.s32.totalorder %s1230_s8, 0  ;;  %s675_s24 = sshll.u32 %s996_s16, 10 }
 0x275   : > { %s1240_s20 = scalar_lea.hbm %s1290_s3, %s675_s24  ;;  %s558_s22 = sshll.u32 %s1209_s11, 4  ;;  %s1243_s22 = int_to_ptr.vmem [resolvable:$true] %s558_s22 }
 0x276   : > { %s876_s27 = scalar_lea.vmem %s1243_s22, %s1230_s8  ;;  %s952_s28 = smov [#allocation7]  }
 0x277   : > { %p877_p0 = scmp.ne.s32.totalorder %s1243_s22, %s876_s27  ;;  %s880_s5 = sshll.u32 %s952_s28, 4  ;;  %s881_s5 = int_to_ptr.vmem [resolvable:$false] %s880_s5 }
 0x278   : > { %s882_s16 = scalar_lea.vmem %s881_s5, 2048  ;;  %p883_p8 = scmp.lt.s32.totalorder %s1243_s22, %s881_s5 }
 0x279   : > { %p878_p7 = pnand %p877_p0, %p668_p5  ;;  %p884_p9 = scmp.lt.s32.totalorder %s882_s16, %s876_s27 }
 0x27b   : > { %p879_p3 = pneg %p878_p7  ;;  %p885_p10 = por %p884_p9, %p883_p8 }
 0x27d   : > { %p886_p6 = pnand %p885_p10, %p879_p3 }
 0x27f   : > { %889 = shalt.err (!%p886_p6)
}
 0x280   : > { %s890_s6 = scalar_lea.hbm %s1240_s20, %s1230_s8  ;;  %s894_s26 = scalar_lea.hbm %s1290_s3, 4352 }
 0x281   : > { %p891_p11 = scmp.ne.s32.totalorder %s1240_s20, %s890_s6  ;;  %p895_p1 = scmp.lt.s32.totalorder %s1240_s20, %s1290_s3 }
 0x282   : > { %p896_p4 = scmp.lt.s32.totalorder %s894_s26, %s890_s6 }
 0x283   : > { %p892_p12 = pnand %p891_p11, %p668_p5 }
 0x284   : > { %p897_p13 = por %p896_p4, %p895_p1 }
 0x285   : > { %p893_p2 = pneg %p892_p12 }
 0x287   : > { %p898_p0 = pnand %p897_p13, %p893_p2 }
 0x289   : > { %901 = shalt.err (!%p898_p0)
}
 0x28a   : > { %s953_s30 = smov 128   ;;  %s954_s9 = smov 8  }
 0x28b   : > { %564 = dma.vmem_to_hbm [thread:$0]  (%p668_p5), %s1243_s22, %s1230_s8, %s1240_s20, %s539_s19, %s953_s30, %s953_s30, %s954_s9  }
 0x28c PF: > { %p744_p7 = scmp.ge.s32.totalorder %s944_s15, 2  ;;  %s573_s24 = sand.u32 1, %s932_s12  }
 0x28d   : > { %p1299_p3 = scmp.ne.s32.totalorder %s1295_s25, 0  ;;  %s574_s10 = scalar_lea.sflag [#allocation4], %s573_s24 }
 0x28f   : > { %p739_p8 = pnand %p744_p7, %p1299_p3 }
 0x291   : > { %p740_p9 = pneg %p739_p8 }
 0x293   : > { %927 = dma.done.wait (%p740_p9), %s574_s10, 1024  }
 0x294   : > { %929 = vsyncadd (%p740_p9), %s574_s10, 4294966272  ;;  %p17_p10 = scmp.ge.s32.totalorder %s1000_s18, 7   ;;  %s1300_s12 = smov %s936_s13 }
 0x295   : > { %s1301_s13 = smov %s940_s14  ;;  %s1302_s14 = smov %s1012_s21 }
 0x296   : > { %s1303_s15 = smov %s1000_s18  ;;  %19 = sbr.rel (!%p17_p10) target bundleno = 6 (0x6), region = 81 }
 0x29b   :  { %579 = vsyncpa [#allocation3], 1 }
 0x29c   :  { %581 = vsyncpa [#allocation3 + $0x1], 1 }
 0x29d   :  { %582 = vsyncpa [#allocation6], 1 }
 0x29e   :  { %583 = vsyncpa [#allocation4], 1 }
 0x29f   :  { %585 = vsyncpa [#allocation4 + $0x1], 1 }

</bundles_post_ra>
